<compile_context>
chip_gen: v7x
topology: tpu7x:2x2x1
jax: 0.10.0
libtpu: 0.0.40
codegen_flags: <defaults>
</compile_context>

<pallas_src>
import functools

import jax
import jax.numpy as jnp
from jax.experimental import pallas as pl
from jax.experimental.pallas import tpu as pltpu


def _round_up(x, m):
    return ((x + m - 1) // m) * m


def actor_kernel(x_ref, w1_ref, b1_ref, w2_ref, b2_ref, w3_ref, b3_ref, o_ref):
    # fc1 (bf16 MXU, f32 acc) + bias + relu
    h1 = jnp.dot(x_ref[...], w1_ref[...], preferred_element_type=jnp.float32)
    h1 = jnp.maximum(h1 + b1_ref[...], 0.0).astype(jnp.bfloat16)
    # fc2 + bias + relu
    h2 = jnp.dot(h1, w2_ref[...], preferred_element_type=jnp.float32)
    h2 = jnp.maximum(h2 + b2_ref[...], 0.0).astype(jnp.bfloat16)
    # fc_mu + bias + tanh (lane-padded output width)
    mu = jnp.dot(h2, w3_ref[...], preferred_element_type=jnp.float32)
    o_ref[...] = jnp.tanh(mu + b3_ref[...]).astype(o_ref.dtype)


@functools.partial(jax.jit, static_argnames=("tile_b",))
def actor_forward(x, params, *, tile_b=None):
    w1, b1, w2, b2, w3, b3 = params
    B, S = x.shape
    H = w1.shape[1]
    A = w3.shape[1]

    # Lane-dense output width (>=128, multiple of 128).
    A_pad = _round_up(max(A, 128), 128)

    # Batch tile: multiple of 8 sublanes, capped so intermediates stay small.
    if tile_b is None:
        tile_b = min(1024, _round_up(B, 8))
    tile_b = _round_up(tile_b, 8)
    B_pad = _round_up(B, tile_b)

    # bf16 operands for the MXU; biases stay f32. Pad batch rows and the
    # fc_mu output columns with zeros (sliced off at the end).
    x_p = jnp.zeros((B_pad, S), jnp.bfloat16).at[:B, :].set(x.astype(jnp.bfloat16))
    w1_b = w1.astype(jnp.bfloat16)
    w2_b = w2.astype(jnp.bfloat16)
    w3_p = jnp.zeros((H, A_pad), jnp.bfloat16).at[:, :A].set(w3.astype(jnp.bfloat16))
    b3_p = jnp.zeros((1, A_pad), jnp.float32).at[:, :A].set(b3)

    grid = (B_pad // tile_b,)

    flops = 2 * B_pad * (S * H + H * H + H * A_pad)
    bytes_accessed = (
        x_p.size * 2                      # bf16 activations in
        + (w1_b.size + w2_b.size + w3_p.size) * 2   # bf16 weights
        + (b1.size + b2.size + b3_p.size) * 4        # f32 biases
        + B_pad * A_pad * 4                          # f32 output
    )

    out = pl.pallas_call(
        actor_kernel,
        out_shape=jax.ShapeDtypeStruct((B_pad, A_pad), jnp.float32),
        grid=grid,
        in_specs=[
            pl.BlockSpec((tile_b, S), lambda i: (i, 0)),   # x tile (pipelined)
            pl.BlockSpec((S, H), lambda i: (0, 0)),        # W1 (resident)
            pl.BlockSpec((1, H), lambda i: (0, 0)),        # b1
            pl.BlockSpec((H, H), lambda i: (0, 0)),        # W2
            pl.BlockSpec((1, H), lambda i: (0, 0)),        # b2
            pl.BlockSpec((H, A_pad), lambda i: (0, 0)),    # W3 (lane-padded)
            pl.BlockSpec((1, A_pad), lambda i: (0, 0)),    # b3
        ],
        out_specs=pl.BlockSpec((tile_b, A_pad), lambda i: (i, 0)),
        compiler_params=pltpu.CompilerParams(
            dimension_semantics=("parallel",),
            vmem_limit_bytes=32 * 1024 * 1024,
        ),
        cost_estimate=pl.CostEstimate(
            flops=flops,
            transcendentals=B_pad * A_pad,
            bytes_accessed=bytes_accessed,
        ),
    )(x_p, w1_b, b1, w2_b, b2, w3_p, b3_p)

    return out[:B, :A]


def init_actor_params(key, state_size, action_size, hidden=256):
    """Mirror the PyTorch module's init: kaiming_uniform (relu gain) for fc1/fc2,
    xavier_uniform for fc_mu, zero biases. Weights stored as (in, out)."""
    k1, k2, k3 = jax.random.split(key, 3)

    def kaiming_uniform(k, fan_in, fan_out):
        bound = jnp.sqrt(2.0) * jnp.sqrt(3.0 / fan_in)
        return jax.random.uniform(k, (fan_in, fan_out), jnp.float32, -bound, bound)

    def xavier_uniform(k, fan_in, fan_out):
        bound = jnp.sqrt(6.0 / (fan_in + fan_out))
        return jax.random.uniform(k, (fan_in, fan_out), jnp.float32, -bound, bound)

    w1 = kaiming_uniform(k1, state_size, hidden)
    b1 = jnp.zeros((1, hidden), jnp.float32)
    w2 = kaiming_uniform(k2, hidden, hidden)
    b2 = jnp.zeros((1, hidden), jnp.float32)
    w3 = xavier_uniform(k3, hidden, action_size)
    b3 = jnp.zeros((1, action_size), jnp.float32)
    return (w1, b1, w2, b2, w3, b3)


def actor_reference_bf16(x, params):
    """Reference mirroring the kernel's bf16-operand / f32-accumulate math."""
    w1, b1, w2, b2, w3, b3 = params
    h1 = jnp.maximum(
        jnp.dot(x.astype(jnp.bfloat16), w1.astype(jnp.bfloat16),
                preferred_element_type=jnp.float32) + b1, 0.0).astype(jnp.bfloat16)
    h2 = jnp.maximum(
        jnp.dot(h1, w2.astype(jnp.bfloat16),
                preferred_element_type=jnp.float32) + b2, 0.0).astype(jnp.bfloat16)
    return jnp.tanh(
        jnp.dot(h2, w3.astype(jnp.bfloat16),
                preferred_element_type=jnp.float32) + b3)


def actor_reference_f32(x, params):
    w1, b1, w2, b2, w3, b3 = params
    h1 = jax.nn.relu(x @ w1 + b1)
    h2 = jax.nn.relu(h1 @ w2 + b2)
    return jnp.tanh(h2 @ w3 + b3)


if __name__ == "__main__":
    batch = 8
    state_size = 16
    action_size = 4

    key = jax.random.PRNGKey(0)
    k_x, k_p = jax.random.split(key)

    x = jax.random.normal(k_x, (batch, state_size), jnp.float32)
    params = init_actor_params(k_p, state_size, action_size)

    out = jax.block_until_ready(actor_forward(x, params))
    ref_bf16 = jax.block_until_ready(actor_reference_bf16(x, params))
    ref_f32 = jax.block_until_ready(actor_reference_f32(x, params))

    assert out.shape == (batch, action_size)
    # Exact-math check against a reference that mirrors the kernel's bf16/f32 mix.
    assert jnp.allclose(out, ref_bf16, atol=2e-3, rtol=2e-3)
    # Looser sanity check against the pure-f32 forward (bf16 quantization noise).
    assert jnp.allclose(out, ref_f32, atol=3e-2, rtol=3e-2)
    print("KERNEL_OK")
</pallas_src>

<mosaic_0001>
module attributes {stable_mosaic.version = 11 : i64} {
  func.func @actor_kernel(%arg0: i32, %arg1: memref<8x16xbf16, #tpu.memory_space<vmem>>, %arg2: memref<16x256xbf16, #tpu.memory_space<vmem>>, %arg3: memref<1x256xf32, #tpu.memory_space<vmem>>, %arg4: memref<256x256xbf16, #tpu.memory_space<vmem>>, %arg5: memref<1x256xf32, #tpu.memory_space<vmem>>, %arg6: memref<256x128xbf16, #tpu.memory_space<vmem>>, %arg7: memref<1x128xf32, #tpu.memory_space<vmem>>, %arg8: memref<8x128xf32, #tpu.memory_space<vmem>>) attributes {dimension_semantics = [#tpu.dimension_semantics<parallel>], iteration_bounds = array<i64: 1>, scalar_prefetch = 0 : i64, scratch_operands = 0 : i64, tpu.core_type = #tpu.core_type<tc>, window_params = [{transform_indices = @transform_0, window_bounds = array<i64: 8, 16>}, {pipeline_mode = #tpu.pipeline_mode<synchronous>, transform_indices = @transform_1, window_bounds = array<i64: 16, 256>}, {pipeline_mode = #tpu.pipeline_mode<synchronous>, transform_indices = @transform_2, window_bounds = array<i64: 1, 256>}, {pipeline_mode = #tpu.pipeline_mode<synchronous>, transform_indices = @transform_3, window_bounds = array<i64: 256, 256>}, {pipeline_mode = #tpu.pipeline_mode<synchronous>, transform_indices = @transform_4, window_bounds = array<i64: 1, 256>}, {pipeline_mode = #tpu.pipeline_mode<synchronous>, transform_indices = @transform_5, window_bounds = array<i64: 256, 128>}, {pipeline_mode = #tpu.pipeline_mode<synchronous>, transform_indices = @transform_6, window_bounds = array<i64: 1, 128>}, {transform_indices = @transform_7, window_bounds = array<i64: 8, 128>}]} {
    %c0 = arith.constant 0 : index
    %c0_0 = arith.constant 0 : index
    %0 = vector.load %arg1[%c0, %c0_0] : memref<8x16xbf16, #tpu.memory_space<vmem>>, vector<8x16xbf16>
    %c0_1 = arith.constant 0 : index
    %c0_2 = arith.constant 0 : index
    %1 = vector.load %arg2[%c0_1, %c0_2] : memref<16x256xbf16, #tpu.memory_space<vmem>>, vector<16x256xbf16>
    %cst = arith.constant dense<0.000000e+00> : vector<8x256xf32>
    %2 = tpu.matmul %0, %1, %cst {dimension_numbers = #tpu.dot_dimension_numbers<[1], [0], [0], [1], [0, 0, 1, 1], [], []>} : vector<8x16xbf16>, vector<16x256xbf16>, vector<8x256xf32> -> vector<8x256xf32>
    %c0_3 = arith.constant 0 : index
    %c0_4 = arith.constant 0 : index
    %3 = vector.load %arg3[%c0_3, %c0_4] : memref<1x256xf32, #tpu.memory_space<vmem>>, vector<1x256xf32>
    %4 = vector.broadcast %3 : vector<1x256xf32> to vector<8x256xf32>
    %5 = arith.addf %2, %4 : vector<8x256xf32>
    %cst_5 = arith.constant 0.000000e+00 : f32
    %6 = vector.broadcast %cst_5 : f32 to vector<8x256xf32>
    %7 = arith.maximumf %5, %6 : vector<8x256xf32>
    %8 = arith.truncf %7 : vector<8x256xf32> to vector<8x256xbf16>
    %c0_6 = arith.constant 0 : index
    %c0_7 = arith.constant 0 : index
    %9 = vector.load %arg4[%c0_6, %c0_7] : memref<256x256xbf16, #tpu.memory_space<vmem>>, vector<256x256xbf16>
    %cst_8 = arith.constant dense<0.000000e+00> : vector<8x256xf32>
    %10 = tpu.matmul %8, %9, %cst_8 {dimension_numbers = #tpu.dot_dimension_numbers<[1], [0], [0], [1], [0, 0, 1, 1], [], []>} : vector<8x256xbf16>, vector<256x256xbf16>, vector<8x256xf32> -> vector<8x256xf32>
    %c0_9 = arith.constant 0 : index
    %c0_10 = arith.constant 0 : index
    %11 = vector.load %arg5[%c0_9, %c0_10] : memref<1x256xf32, #tpu.memory_space<vmem>>, vector<1x256xf32>
    %12 = vector.broadcast %11 : vector<1x256xf32> to vector<8x256xf32>
    %13 = arith.addf %10, %12 : vector<8x256xf32>
    %cst_11 = arith.constant 0.000000e+00 : f32
    %14 = vector.broadcast %cst_11 : f32 to vector<8x256xf32>
    %15 = arith.maximumf %13, %14 : vector<8x256xf32>
    %16 = arith.truncf %15 : vector<8x256xf32> to vector<8x256xbf16>
    %c0_12 = arith.constant 0 : index
    %c0_13 = arith.constant 0 : index
    %17 = vector.load %arg6[%c0_12, %c0_13] : memref<256x128xbf16, #tpu.memory_space<vmem>>, vector<256x128xbf16>
    %cst_14 = arith.constant dense<0.000000e+00> : vector<8x128xf32>
    %18 = tpu.matmul %16, %17, %cst_14 {dimension_numbers = #tpu.dot_dimension_numbers<[1], [0], [0], [1], [0, 0, 1, 1], [], []>} : vector<8x256xbf16>, vector<256x128xbf16>, vector<8x128xf32> -> vector<8x128xf32>
    %c0_15 = arith.constant 0 : index
    %c0_16 = arith.constant 0 : index
    %19 = vector.load %arg7[%c0_15, %c0_16] : memref<1x128xf32, #tpu.memory_space<vmem>>, vector<1x128xf32>
    %20 = vector.broadcast %19 : vector<1x128xf32> to vector<8x128xf32>
    %21 = arith.addf %18, %20 : vector<8x128xf32>
    %22 = math.tanh %21 : vector<8x128xf32>
    %c0_17 = arith.constant 0 : index
    %c0_18 = arith.constant 0 : index
    %23 = vector.load %arg8[%c0_17, %c0_18] : memref<8x128xf32, #tpu.memory_space<vmem>>, vector<8x128xf32>
    tpu.vector_store %arg8[%c0_17, %c0_18], %22 {strides = array<i32>} : memref<8x128xf32, #tpu.memory_space<vmem>>, vector<8x128xf32>,
    return
  }
  func.func @transform_0(%arg0: i32) -> (i32, i32) {
    %c0_i32 = arith.constant 0 : i32
    %c0_i32_0 = arith.constant 0 : i32
    return %arg0, %c0_i32 : i32, i32
  }
  func.func @transform_1(%arg0: i32) -> (i32, i32) {
    %c0_i32 = arith.constant 0 : i32
    %c0_i32_0 = arith.constant 0 : i32
    %c0_i32_1 = arith.constant 0 : i32
    return %c0_i32, %c0_i32_0 : i32, i32
  }
  func.func @transform_2(%arg0: i32) -> (i32, i32) {
    %c0_i32 = arith.constant 0 : i32
    %c0_i32_0 = arith.constant 0 : i32
    %c0_i32_1 = arith.constant 0 : i32
    return %c0_i32, %c0_i32_0 : i32, i32
  }
  func.func @transform_3(%arg0: i32) -> (i32, i32) {
    %c0_i32 = arith.constant 0 : i32
    %c0_i32_0 = arith.constant 0 : i32
    %c0_i32_1 = arith.constant 0 : i32
    return %c0_i32, %c0_i32_0 : i32, i32
  }
  func.func @transform_4(%arg0: i32) -> (i32, i32) {
    %c0_i32 = arith.constant 0 : i32
    %c0_i32_0 = arith.constant 0 : i32
    %c0_i32_1 = arith.constant 0 : i32
    return %c0_i32, %c0_i32_0 : i32, i32
  }
  func.func @transform_5(%arg0: i32) -> (i32, i32) {
    %c0_i32 = arith.constant 0 : i32
    %c0_i32_0 = arith.constant 0 : i32
    %c0_i32_1 = arith.constant 0 : i32
    return %c0_i32, %c0_i32_0 : i32, i32
  }
  func.func @transform_6(%arg0: i32) -> (i32, i32) {
    %c0_i32 = arith.constant 0 : i32
    %c0_i32_0 = arith.constant 0 : i32
    %c0_i32_1 = arith.constant 0 : i32
    return %c0_i32, %c0_i32_0 : i32, i32
  }
  func.func @transform_7(%arg0: i32) -> (i32, i32) {
    %c0_i32 = arith.constant 0 : i32
    %c0_i32_0 = arith.constant 0 : i32
    return %arg0, %c0_i32 : i32, i32
  }
}

</mosaic_0001>

<bundles_post_ra>
// kernel: actor_forward.1
= control target key start
LH: loop header
LB: loop body
LE: loop exit
PB: predicated region body
PF: predicated region fallthrough
CT: control target
= control target key end

     0   :  { %v675_v1 = vmov 0   ;;  %vm52_vm0 = vcmask 130048   ;;  %v32_v48 = vlaneseq  ;;  %s881_s1 = inlined_call_operand.vmem [shape: bf16[16,256], index: 1, kind: input, shape index: {}]   ;;  %s882_s0 = inlined_call_operand.vmem [shape: bf16[8,16], index: 0, kind: input, shape index: {}]   ;;  %s883_s3 = inlined_call_operand.vmem [shape: bf16[256,256], index: 3, kind: input, shape index: {}]   ;;  %s884_s5 = inlined_call_operand.vmem [shape: bf16[256,128], index: 5, kind: input, shape index: {}]   ;;  %s885_s2 = inlined_call_operand.vmem [shape: f32[1,256], index: 2, kind: input, shape index: {}]   ;;  %s886_s4 = inlined_call_operand.vmem [shape: f32[1,256], index: 4, kind: input, shape index: {}]   ;;  %s887_s6 = inlined_call_operand.vmem [shape: f32[1,128], index: 6, kind: input, shape index: {}]   ;;  %s888_s7 = inlined_call_operand.vmem [shape: f32[8,128], index: 7, kind: output, shape index: {}]  }
   0x1   :  { %v606_v0 = vld [vmem:[%s881_s1 + $0x4] ss:$8 sps:$4 sm:$0xff]   ;;  %88 = vmatprep.mubr.bf16.mxu0 %v675_v1  ;;  %v608_v2 = vld [vmem:[%s881_s1] ss:$8 sps:$4 sm:$0xff]   ;;  %v612_v6 = vld [vmem:[%s883_s3 + $0x14] ss:$8 sps:$4 sm:$0xff]  }
   0x2   :  { %v27_v3 = vld [vmem:[%s882_s0] sm:$0xf]  ;;  %56 = vmatprep.subr.bf16.mxu0 %v606_v0  ;;  %v609_v4 = vld [vmem:[%s883_s3 + $0x4] ss:$8 sps:$4 sm:$0xff]   ;;  %v614_v7 = vld [vmem:[%s883_s3 + $0x10] ss:$8 sps:$4 sm:$0xff]  }
   0x3   :  { %v611_v5 = vld [vmem:[%s883_s3] ss:$8 sps:$4 sm:$0xff]   ;;  %57 = vmatpush1.bf16.msra.mxu0 %v608_v2  ;;  %305 = vmatprep.subr.bf16.mxu1 %v609_v4  ;;  %v615_v8 = vld [vmem:[%s883_s3 + $0x24] ss:$8 sps:$4 sm:$0xff]   ;;  %v618_v10 = vld [vmem:[%s883_s3 + $0x34] ss:$8 sps:$4 sm:$0xff]  }
   0x4   :  { %306 = vmatpush1.bf16.msra.mxu1 %v611_v5  ;;  %v617_v9 = vld [vmem:[%s883_s3 + $0x20] ss:$8 sps:$4 sm:$0xff]   ;;  %v620_v11 = vld [vmem:[%s883_s3 + $0x30] ss:$8 sps:$4 sm:$0xff]   ;;  %v621_v12 = vld [vmem:[%s883_s3 + $0x44] ss:$8 sps:$4 sm:$0xff]  }
   0x5   :  { %307 = vmatprep.subr.bf16.mxu1 %v612_v6  ;;  %v623_v13 = vld [vmem:[%s883_s3 + $0x40] ss:$8 sps:$4 sm:$0xff]   ;;  %v624_v14 = vld [vmem:[%s883_s3 + $0x54] ss:$8 sps:$4 sm:$0xff]   ;;  %v626_v15 = vld [vmem:[%s883_s3 + $0x50] ss:$8 sps:$4 sm:$0xff]  }
   0x6   :  { %533 = vmatmul.mubr.msk.bf16.vlgmr.msra.gmra.mrb[0].mxu0 %vm52_vm0, %v27_v3  ;;  %v627_v16 = vld [vmem:[%s883_s3 + $0x64] ss:$8 sps:$4 sm:$0xff]   ;;  %v629_v17 = vld [vmem:[%s883_s3 + $0x60] ss:$8 sps:$4 sm:$0xff]   ;;  %v630_v18 = vld [vmem:[%s883_s3 + $0x74] ss:$8 sps:$4 sm:$0xff]  }
   0x7   :  { %v632_v19 = vld [vmem:[%s883_s3 + $0x70] ss:$8 sps:$4 sm:$0xff]   ;;  %v633_v20 = vld [vmem:[%s883_s3 + $0x84] ss:$8 sps:$4 sm:$0xff]   ;;  %v635_v21 = vld [vmem:[%s883_s3 + $0x80] ss:$8 sps:$4 sm:$0xff]  }
   0x8   :  { %308 = vmatpush1.bf16.msra.mxu1 %v614_v7  ;;  %v636_v22 = vld [vmem:[%s883_s3 + $0x94] ss:$8 sps:$4 sm:$0xff]   ;;  %v638_v23 = vld [vmem:[%s883_s3 + $0x90] ss:$8 sps:$4 sm:$0xff]   ;;  %v639_v24 = vld [vmem:[%s883_s3 + $0xa4] ss:$8 sps:$4 sm:$0xff]  }
   0x9   :  { %309 = vmatprep.subr.bf16.mxu1 %v615_v8  ;;  %v641_v25 = vld [vmem:[%s883_s3 + $0xa0] ss:$8 sps:$4 sm:$0xff]   ;;  %v642_v26 = vld [vmem:[%s883_s3 + $0xb4] ss:$8 sps:$4 sm:$0xff]   ;;  %v644_v27 = vld [vmem:[%s883_s3 + $0xb0] ss:$8 sps:$4 sm:$0xff]  }
   0xa   :  { %v645_v28 = vld [vmem:[%s883_s3 + $0xc4] ss:$8 sps:$4 sm:$0xff]   ;;  %v647_v29 = vld [vmem:[%s883_s3 + $0xc0] ss:$8 sps:$4 sm:$0xff]   ;;  %v648_v30 = vld [vmem:[%s883_s3 + $0xd4] ss:$8 sps:$4 sm:$0xff]  }
   0xb   :  { %v650_v31 = vld [vmem:[%s883_s3 + $0xd0] ss:$8 sps:$4 sm:$0xff]   ;;  %v651_v32 = vld [vmem:[%s883_s3 + $0xe4] ss:$8 sps:$4 sm:$0xff]   ;;  %v653_v33 = vld [vmem:[%s883_s3 + $0xe0] ss:$8 sps:$4 sm:$0xff]  }
   0xc   :  { %310 = vmatpush1.bf16.msra.mxu1 %v617_v9  ;;  %v654_v34 = vld [vmem:[%s883_s3 + $0xf4] ss:$8 sps:$4 sm:$0xff]   ;;  %v656_v35 = vld [vmem:[%s883_s3 + $0xf0] ss:$8 sps:$4 sm:$0xff]   ;;  %v657_v36 = vld [vmem:[%s884_s5 + $0x40] sm:$0xff]   ;;  %v33_v49 = vshrl.u32 %v32_v48, 7 }
   0xd   :  { %311 = vmatprep.subr.bf16.mxu1 %v618_v10  ;;  %v658_v37 = vld [vmem:[%s884_s5] sm:$0xff]   ;;  %583 = vmatprep.subr.bf16.mxu0 %v657_v36  ;;  %v659_v38 = vld [vmem:[%s884_s5 + $0x48] sm:$0xff]   ;;  %v661_v40 = vld [vmem:[%s884_s5 + $0x50] sm:$0xff]  }
   0xe   :  { %584 = vmatpush3.bf16.msra.mxu0 %v658_v37  ;;  %v660_v39 = vld [vmem:[%s884_s5 + $0x8] sm:$0xff]   ;;  %v662_v41 = vld [vmem:[%s884_s5 + $0x10] sm:$0xff]   ;;  %v663_v42 = vld [vmem:[%s884_s5 + $0x58] sm:$0xff]   ;;  %v34_v50 = vsub.s32 0, %v33_v49  ;;  %v38_v52 = vsub.s32 1, %v33_v49 }
   0xf   :  { %585 = vmatprep.subr.bf16.mxu0 %v659_v38  ;;  %v664_v43 = vld [vmem:[%s884_s5 + $0x18] sm:$0xff]   ;;  %v665_v44 = vld [vmem:[%s884_s5 + $0x60] sm:$0xff]   ;;  %v667_v46 = vld [vmem:[%s884_s5 + $0x68] sm:$0xff]  }
  0x10   :  { %312 = vmatpush1.bf16.msra.mxu1 %v620_v11  ;;  %v666_v45 = vld [vmem:[%s884_s5 + $0x20] sm:$0xff]   ;;  %v668_v47 = vld [vmem:[%s884_s5 + $0x28] sm:$0xff]   ;;  %v669_v1 = vld [vmem:[%s884_s5 + $0x70] sm:$0xff]  }
  0x11   :  { %313 = vmatprep.subr.bf16.mxu1 %v621_v12  ;;  %v30_v51 = vld [vmem:[%s885_s2] sm:$0x3]  ;;  %v670_v2 = vld [vmem:[%s884_s5 + $0x30] sm:$0xff]   ;;  %v671_v3 = vld [vmem:[%s884_s5 + $0x78] sm:$0xff]  }
  0x12   :  { %586 = vmatpush3.bf16.msra.mxu0 %v660_v39  ;;  %v35_v53 = vrot.slane %v30_v51, %v34_v50  ;;  %v39_v54 = vrot.slane %v30_v51, %v38_v52  ;;  %v672_v4 = vld [vmem:[%s884_s5 + $0x38] sm:$0xff]   ;;  %v133_v5 = vld [vmem:[%s886_s4] sm:$0x3] }
  0x13   :  { %587 = vmatprep.subr.bf16.mxu0 %v661_v40  ;;  %v138_v6 = vrot.slane %v133_v5, %v34_v50  ;;  %v142_v7 = vrot.slane %v133_v5, %v38_v52 }
  0x14   :  { %314 = vmatpush1.bf16.msra.mxu1 %v623_v13 }
  0x15   :  { %315 = vmatprep.subr.bf16.mxu1 %v624_v14 }
  0x16   :  { %588 = vmatpush3.bf16.msra.mxu0 %v662_v41 }
  0x17   :  { %589 = vmatprep.subr.bf16.mxu0 %v663_v42 }
  0x18   :  { %316 = vmatpush1.bf16.msra.mxu1 %v626_v15 }
  0x19   :  { %317 = vmatprep.subr.bf16.mxu1 %v627_v16 }
  0x1a   :  { %590 = vmatpush3.bf16.msra.mxu0 %v664_v43 }
  0x1b   :  { %591 = vmatprep.subr.bf16.mxu0 %v665_v44 }
  0x1c   :  { %318 = vmatpush1.bf16.msra.mxu1 %v629_v17 }
  0x1d   :  { %319 = vmatprep.subr.bf16.mxu1 %v630_v18 }
  0x1e   :  { %592 = vmatpush3.bf16.msra.mxu0 %v666_v45 }
  0x1f   :  { %593 = vmatprep.subr.bf16.mxu0 %v667_v46 }
  0x20   :  { %320 = vmatpush1.bf16.msra.mxu1 %v632_v19  ;;  %v566_v19 = vld [vmem:[%s887_s6] ss:$0 sm:$0xff] }
  0x21   :  { %321 = vmatprep.subr.bf16.mxu1 %v633_v20 }
  0x22   :  { %594 = vmatpush3.bf16.msra.mxu0 %v668_v47 }
  0x23   :  { %595 = vmatprep.subr.bf16.mxu0 %v669_v1 }
  0x24   :  { %322 = vmatpush1.bf16.msra.mxu1 %v635_v21 }
  0x25   :  { %323 = vmatprep.subr.bf16.mxu1 %v636_v22 }
  0x26   :  { %596 = vmatpush3.bf16.msra.mxu0 %v670_v2 }
  0x27   :  { %597 = vmatprep.subr.bf16.mxu0 %v671_v3 }
  0x28   :  { %324 = vmatpush1.bf16.msra.mxu1 %v638_v23 }
  0x29   :  { %325 = vmatprep.subr.bf16.mxu1 %v639_v24 }
  0x2a   :  { %598 = vmatpush3.bf16.msra.mxu0 %v672_v4 }
  0x2c   :  { %326 = vmatpush1.bf16.msra.mxu1 %v641_v25 }
  0x2d   :  { %327 = vmatprep.subr.bf16.mxu1 %v642_v26 }
  0x30   :  { %328 = vmatpush1.bf16.msra.mxu1 %v644_v27 }
  0x31   :  { %329 = vmatprep.subr.bf16.mxu1 %v645_v28 }
  0x34   :  { %330 = vmatpush1.bf16.msra.mxu1 %v647_v29 }
  0x35   :  { %331 = vmatprep.subr.bf16.mxu1 %v648_v30 }
  0x38   :  { %332 = vmatpush1.bf16.msra.mxu1 %v650_v31 }
  0x39   :  { %333 = vmatprep.subr.bf16.mxu1 %v651_v32 }
  0x3c   :  { %334 = vmatpush1.bf16.msra.mxu1 %v653_v33 }
  0x3d   :  { %335 = vmatprep.subr.bf16.mxu1 %v654_v34 }
  0x40   :  { %336 = vmatpush1.bf16.msra.mxu1 %v656_v35 }
  0xd9   :  { %v90_v55 = vpop.f32.mrb[0].mxu0 }
  0xda   :  { %v91_v56 = vadd.f32 %v90_v55, %v35_v53  ;;  %v92_v57 = vpop.f32.mrb[1].mxu0 }
  0xdb   :  { %v93_v58 = vadd.f32 %v92_v57, %v39_v54  ;;  %v94_v59 = vpop.f32.mrb[2].mxu0 }
  0xdc   :  { %v97_v60 = vmax.f32 %v91_v56, 0.0  ;;  %v95_v61 = vpop.f32.mrb[3].mxu0 }
  0xdd   :  { %v98_v62 = vmax.f32 %v93_v58, 0.0 }
  0xde   :  { %v99_v0 = vpack.c.bf16 %v97_v60, %v97_v60 }
  0xdf   :  { %v100_v63 = vpack.c.bf16 %v98_v62, %v98_v62 }
  0xe1   :  { %337 = vmatprep.mubr.bf16.mxu1 %v100_v63 }
  0xe2   :  { %338 = vmatmul.mubr.bf16.vlgmr.msra.gmra.mrb[0].mxu1 %v99_v0 }
 0x1b5   :  { %v339_v8 = vpop.f32.mrb[0].mxu1 }
 0x1b6   :  { %v340_v9 = vadd.f32 %v339_v8, %v138_v6  ;;  %v341_v10 = vpop.f32.mrb[1].mxu1 }
 0x1b7   :  { %v342_v11 = vadd.f32 %v341_v10, %v142_v7  ;;  %v343_v12 = vpop.f32.mrb[2].mxu1 }
 0x1b8   :  { %v346_v13 = vmax.f32 %v340_v9, 0.0  ;;  %v344_v14 = vpop.f32.mrb[3].mxu1 }
 0x1b9   :  { %v347_v15 = vmax.f32 %v342_v11, 0.0 }
 0x1ba   :  { %v348_v17 = vpack.c.bf16 %v346_v13, %v346_v13 }
 0x1bb   :  { %v349_v16 = vpack.c.bf16 %v347_v15, %v347_v15 }
 0x1bd   :  { %517 = vmatprep.mubr.bf16.mxu0 %v349_v16 }
 0x1be   :  { %518 = vmatmul.mubr.bf16.vlgmr.msra.gmra.mrb[4].mxu0 %v348_v17 }
 0x291   :  { %v599_v18 = vpop.f32.mrb[4].mxu0 }
 0x292   :  { %v600_v20 = vpop.f32.mrb[5].mxu0 }
 0x293   :  { %v601_v21 = vadd.f32 %v600_v20, %v599_v18  ;;  %v602_v22 = vpop.f32.mrb[6].mxu0 }
 0x294   :  { %v603_v23 = vpop.f32.mrb[7].mxu0 }
 0x295   :  { %v520_v24 = vadd.f32 %v601_v21, %v566_v19 }
 0x297   :  { %673 = vtanh.f32 %v520_v24 }
 0x2a1   :  { %v674_v25 = vpop.eup %673 }
 0x2a2   :  { %526 = vst [vmem:[%s888_s7] sm:$0xff] %v674_v25 }

</bundles_post_ra>
